<compile_context>
chip_gen: v5e
topology: v5e:2x2
jax: 0.10.0
libtpu: 0.0.40
codegen_flags: <defaults>
</compile_context>

<pallas_src>
import jax
import jax.numpy as jnp
from jax.experimental import pallas as pl
from jax.experimental.pallas import tpu as pltpu

LANES = 128
SUBLANES = 8
# 1024 sublane rows * 128 lanes = 131072 batch elements per grid step:
# x tile = 3*1024*128*4 B = 1.5 MB, out tile = 0.5 MB.  Double-buffered this is
# ~4 MB, well under v5e/v6e's 16/32 MiB scoped VMEM and v7x's 32 MiB scoped
# (64 MiB physical) budget, so no vmem_limit_bytes override is needed.
MAX_RB = 1024


def mlp_kernel(x_ref, w1_ref, b1_ref, w2_ref, b2_ref, o_ref):
    # x_ref : (3, RB, 128) VMEM   -- feature-major, batch dense over sublanes+lanes
    # w1_ref: (2, 3)  SMEM        b1_ref: (2,) SMEM
    # w2_ref: (1, 2)  SMEM        b2_ref: (1,) SMEM
    # o_ref : (RB, 128) VMEM      -- fully dense output block
    x0 = x_ref[0]                       # (RB, 128) plain row loads, no relayout
    x1 = x_ref[1]
    x2 = x_ref[2]

    # Hidden layer (3 -> 2): VPU broadcast multiply-accumulate with SMEM scalars.
    h0 = x0 * w1_ref[0, 0] + x1 * w1_ref[0, 1] + x2 * w1_ref[0, 2] + b1_ref[0]
    h1 = x0 * w1_ref[1, 0] + x1 * w1_ref[1, 1] + x2 * w1_ref[1, 2] + b1_ref[1]
    h0 = jnp.maximum(h0, 0.0)           # ReLU on VPU
    h1 = jnp.maximum(h1, 0.0)

    # Output layer (2 -> 1): again pure VPU, written as one dense (RB,128) store.
    o_ref[...] = (h0 * w2_ref[0, 0] + h1 * w2_ref[0, 1] + b2_ref[0]).astype(o_ref.dtype)


def _round_up(a, m):
    return ((a + m - 1) // m) * m


def mlp_forward(x, w1, b1, w2, b2):
    """x: (B, 3); w1: (2, 3); b1: (2,); w2: (1, 2); b2: (1,)  (PyTorch nn.Linear layout)."""
    B = x.shape[0]

    # Batch -> (rows, 128) dense layout; rows tiled by RB (multiple of 8).
    rows = pl.cdiv(B, LANES)
    rb = min(MAX_RB, _round_up(rows, SUBLANES))
    rows_pad = _round_up(rows, rb)
    b_pad = rows_pad * LANES

    # Layout plumbing (fused with the kernel under a single jit):
    # pad batch, go feature-major, fold batch into (rows, 128).
    # TODO(synk): if the upstream producer can emit feature-major (3, B) data,
    # drop the transpose entirely (the kernel is a ~16 B/elem streaming op).
    x_pad = jnp.pad(x, ((0, b_pad - B), (0, 0)))
    x_t = x_pad.T.reshape(3, rows_pad, LANES)

    out = pl.pallas_call(
        mlp_kernel,
        out_shape=jax.ShapeDtypeStruct((rows_pad, LANES), x.dtype),
        grid=(rows_pad // rb,),
        in_specs=[
            pl.BlockSpec((3, rb, LANES), lambda i: (0, i, 0)),   # x tile (dense)
            pl.BlockSpec(memory_space=pltpu.MemorySpace.SMEM),   # w1 scalars
            pl.BlockSpec(memory_space=pltpu.MemorySpace.SMEM),   # b1 scalars
            pl.BlockSpec(memory_space=pltpu.MemorySpace.SMEM),   # w2 scalars
            pl.BlockSpec(memory_space=pltpu.MemorySpace.SMEM),   # b2 scalars
        ],
        out_specs=pl.BlockSpec((rb, LANES), lambda i: (i, 0)),   # dense output block
        compiler_params=pltpu.CompilerParams(
            dimension_semantics=("parallel",),   # shard batch grid across TCs on v7x
        ),
    )(x_t, w1, b1, w2, b2)

    # Back to PyTorch's (B, 1); padded tail rows (finite: relu(b1)@w2+b2) are dropped.
    return out.reshape(b_pad)[:B].reshape(B, 1)


if __name__ == "__main__":
    key = jax.random.PRNGKey(0)
    k_x, k_w1, k_b1, k_w2, k_b2 = jax.random.split(key, 5)

    B = 8  # the original script used a single ones(3) row; keep the test small
    x = jax.random.normal(k_x, (B, 3), dtype=jnp.float32)

    # Deterministic synthetic parameters (PyTorch nn.Linear shapes).
    w1 = jax.random.normal(k_w1, (2, 3), dtype=jnp.float32) * 0.5
    b1 = jax.random.normal(k_b1, (2,), dtype=jnp.float32) * 0.5
    w2 = jax.random.normal(k_w2, (1, 2), dtype=jnp.float32) * 0.5
    b2 = jax.random.normal(k_b2, (1,), dtype=jnp.float32) * 0.5

    # Single jit around pad + transpose + kernel + slice so layout plumbing fuses.
    mlp = jax.jit(mlp_forward)
    out = jax.block_until_ready(mlp(x, w1, b1, w2, b2))

    # Reference check in plain JAX (same math as the PyTorch forward).
    ref = jnp.maximum(x @ w1.T + b1, 0.0) @ w2.T + b2
    assert out.shape == (B, 1)
    assert jnp.allclose(out, ref, atol=1e-5, rtol=1e-5)

    print("KERNEL_OK")
</pallas_src>

<mosaic_0001>
module attributes {stable_mosaic.version = 11 : i64} {
  func.func @mlp_kernel(%arg0: i32, %arg1: memref<3x8x128xf32, #tpu.memory_space<vmem>>, %arg2: memref<2x3xf32, #tpu.memory_space<smem>>, %arg3: memref<2xf32, #tpu.memory_space<smem>>, %arg4: memref<1x2xf32, #tpu.memory_space<smem>>, %arg5: memref<1xf32, #tpu.memory_space<smem>>, %arg6: memref<8x128xf32, #tpu.memory_space<vmem>>) attributes {dimension_semantics = [#tpu.dimension_semantics<parallel>], iteration_bounds = array<i64: 1>, scalar_prefetch = 0 : i64, scratch_operands = 0 : i64, tpu.core_type = #tpu.core_type<tc>, window_params = [{transform_indices = @transform_0, window_bounds = array<i64: 3, 8, 128>}, {transform_indices = @transform_1, window_bounds = array<i64: 2, 3>}, {transform_indices = @transform_2, window_bounds = array<i64: 2>}, {transform_indices = @transform_3, window_bounds = array<i64: 1, 2>}, {transform_indices = @transform_4, window_bounds = array<i64: 1>}, {transform_indices = @transform_5, window_bounds = array<i64: 8, 128>}]} {
    %c0 = arith.constant 0 : index
    %c0_0 = arith.constant 0 : index
    %c0_1 = arith.constant 0 : index
    %0 = vector.load %arg1[%c0, %c0_0, %c0_1] : memref<3x8x128xf32, #tpu.memory_space<vmem>>, vector<1x8x128xf32>
    %1 = vector.shape_cast %0 : vector<1x8x128xf32> to vector<8x128xf32>
    %c1 = arith.constant 1 : index
    %c0_2 = arith.constant 0 : index
    %c0_3 = arith.constant 0 : index
    %2 = vector.load %arg1[%c1, %c0_2, %c0_3] : memref<3x8x128xf32, #tpu.memory_space<vmem>>, vector<1x8x128xf32>
    %3 = vector.shape_cast %2 : vector<1x8x128xf32> to vector<8x128xf32>
    %c2 = arith.constant 2 : index
    %c0_4 = arith.constant 0 : index
    %c0_5 = arith.constant 0 : index
    %4 = vector.load %arg1[%c2, %c0_4, %c0_5] : memref<3x8x128xf32, #tpu.memory_space<vmem>>, vector<1x8x128xf32>
    %5 = vector.shape_cast %4 : vector<1x8x128xf32> to vector<8x128xf32>
    %c0_6 = arith.constant 0 : index
    %c0_7 = arith.constant 0 : index
    %6 = memref.load %arg2[%c0_6, %c0_7] : memref<2x3xf32, #tpu.memory_space<smem>>
    %7 = vector.broadcast %6 : f32 to vector<8x128xf32>
    %8 = arith.mulf %1, %7 : vector<8x128xf32>
    %c0_8 = arith.constant 0 : index
    %c1_9 = arith.constant 1 : index
    %9 = memref.load %arg2[%c0_8, %c1_9] : memref<2x3xf32, #tpu.memory_space<smem>>
    %10 = vector.broadcast %9 : f32 to vector<8x128xf32>
    %11 = arith.mulf %3, %10 : vector<8x128xf32>
    %12 = arith.addf %8, %11 : vector<8x128xf32>
    %c0_10 = arith.constant 0 : index
    %c2_11 = arith.constant 2 : index
    %13 = memref.load %arg2[%c0_10, %c2_11] : memref<2x3xf32, #tpu.memory_space<smem>>
    %14 = vector.broadcast %13 : f32 to vector<8x128xf32>
    %15 = arith.mulf %5, %14 : vector<8x128xf32>
    %16 = arith.addf %12, %15 : vector<8x128xf32>
    %c0_12 = arith.constant 0 : index
    %17 = memref.load %arg3[%c0_12] : memref<2xf32, #tpu.memory_space<smem>>
    %18 = vector.broadcast %17 : f32 to vector<8x128xf32>
    %19 = arith.addf %16, %18 : vector<8x128xf32>
    %c1_13 = arith.constant 1 : index
    %c0_14 = arith.constant 0 : index
    %20 = memref.load %arg2[%c1_13, %c0_14] : memref<2x3xf32, #tpu.memory_space<smem>>
    %21 = vector.broadcast %20 : f32 to vector<8x128xf32>
    %22 = arith.mulf %1, %21 : vector<8x128xf32>
    %c1_15 = arith.constant 1 : index
    %c1_16 = arith.constant 1 : index
    %23 = memref.load %arg2[%c1_15, %c1_16] : memref<2x3xf32, #tpu.memory_space<smem>>
    %24 = vector.broadcast %23 : f32 to vector<8x128xf32>
    %25 = arith.mulf %3, %24 : vector<8x128xf32>
    %26 = arith.addf %22, %25 : vector<8x128xf32>
    %c1_17 = arith.constant 1 : index
    %c2_18 = arith.constant 2 : index
    %27 = memref.load %arg2[%c1_17, %c2_18] : memref<2x3xf32, #tpu.memory_space<smem>>
    %28 = vector.broadcast %27 : f32 to vector<8x128xf32>
    %29 = arith.mulf %5, %28 : vector<8x128xf32>
    %30 = arith.addf %26, %29 : vector<8x128xf32>
    %c1_19 = arith.constant 1 : index
    %31 = memref.load %arg3[%c1_19] : memref<2xf32, #tpu.memory_space<smem>>
    %32 = vector.broadcast %31 : f32 to vector<8x128xf32>
    %33 = arith.addf %30, %32 : vector<8x128xf32>
    %cst = arith.constant 0.000000e+00 : f32
    %34 = vector.broadcast %cst : f32 to vector<8x128xf32>
    %35 = arith.maximumf %19, %34 : vector<8x128xf32>
    %cst_20 = arith.constant 0.000000e+00 : f32
    %36 = vector.broadcast %cst_20 : f32 to vector<8x128xf32>
    %37 = arith.maximumf %33, %36 : vector<8x128xf32>
    %c0_21 = arith.constant 0 : index
    %c0_22 = arith.constant 0 : index
    %38 = memref.load %arg4[%c0_21, %c0_22] : memref<1x2xf32, #tpu.memory_space<smem>>
    %39 = vector.broadcast %38 : f32 to vector<8x128xf32>
    %40 = arith.mulf %35, %39 : vector<8x128xf32>
    %c0_23 = arith.constant 0 : index
    %c1_24 = arith.constant 1 : index
    %41 = memref.load %arg4[%c0_23, %c1_24] : memref<1x2xf32, #tpu.memory_space<smem>>
    %42 = vector.broadcast %41 : f32 to vector<8x128xf32>
    %43 = arith.mulf %37, %42 : vector<8x128xf32>
    %44 = arith.addf %40, %43 : vector<8x128xf32>
    %c0_25 = arith.constant 0 : index
    %45 = memref.load %arg5[%c0_25] : memref<1xf32, #tpu.memory_space<smem>>
    %46 = vector.broadcast %45 : f32 to vector<8x128xf32>
    %47 = arith.addf %44, %46 : vector<8x128xf32>
    %c0_26 = arith.constant 0 : index
    %c0_27 = arith.constant 0 : index
    %48 = vector.load %arg6[%c0_26, %c0_27] : memref<8x128xf32, #tpu.memory_space<vmem>>, vector<8x128xf32>
    tpu.vector_store %arg6[%c0_26, %c0_27], %47 {strides = array<i32>} : memref<8x128xf32, #tpu.memory_space<vmem>>, vector<8x128xf32>,
    return
  }
  func.func @transform_0(%arg0: i32) -> (i32, i32, i32) {
    %c0_i32 = arith.constant 0 : i32
    %c0_i32_0 = arith.constant 0 : i32
    %c0_i32_1 = arith.constant 0 : i32
    return %c0_i32, %arg0, %c0_i32_0 : i32, i32, i32
  }
  func.func @transform_1(%arg0: i32) -> (i32, i32) {
    %c0_i32 = arith.constant 0 : i32
    %c0_i32_0 = arith.constant 0 : i32
    %c0_i32_1 = arith.constant 0 : i32
    return %c0_i32, %c0_i32_0 : i32, i32
  }
  func.func @transform_2(%arg0: i32) -> i32 {
    %c0_i32 = arith.constant 0 : i32
    %c0_i32_0 = arith.constant 0 : i32
    return %c0_i32 : i32
  }
  func.func @transform_3(%arg0: i32) -> (i32, i32) {
    %c0_i32 = arith.constant 0 : i32
    %c0_i32_0 = arith.constant 0 : i32
    %c0_i32_1 = arith.constant 0 : i32
    return %c0_i32, %c0_i32_0 : i32, i32
  }
  func.func @transform_4(%arg0: i32) -> i32 {
    %c0_i32 = arith.constant 0 : i32
    %c0_i32_0 = arith.constant 0 : i32
    return %c0_i32 : i32
  }
  func.func @transform_5(%arg0: i32) -> (i32, i32) {
    %c0_i32 = arith.constant 0 : i32
    %c0_i32_0 = arith.constant 0 : i32
    return %arg0, %c0_i32 : i32, i32
  }
}

</mosaic_0001>

<bundles_post_ra>
// kernel: mlp_forward.1
= control target key start
LH: loop header
LB: loop body
LE: loop exit
PB: predicated region body
PF: predicated region fallthrough
CT: control target
= control target key end

     0   :  { %11 = vsyncpa [#allocation4], 0  ;;  %s218_s0 = inlined_call_operand.vmem [shape: f32[3,8,128], index: 0, kind: input, shape index: {}]   ;;  %s219_s1 = inlined_call_operand.vmem [shape: f32[2,3], index: 1, kind: input, shape index: {}]   ;;  %s220_s2 = inlined_call_operand.vmem [shape: f32[2], index: 2, kind: input, shape index: {}]   ;;  %s221_s3 = inlined_call_operand.vmem [shape: f32[1,2], index: 3, kind: input, shape index: {}]   ;;  %s222_s4 = inlined_call_operand.<no memory space> [shape: f32[1], index: 4, kind: input, shape index: {}]   ;;  %s223_s5 = inlined_call_operand.vmem [shape: f32[8,128], index: 5, kind: output, shape index: {}]  }
   0x1   :  { %12 = vsyncpa [#allocation6], 0  ;;  %s29_s20 = sshll.u32 %s220_s2, 4  ;;  %s20_s23 = sshll.u32 %s219_s1, 4  ;;  %s30_s20 = int_to_ptr.vmem [resolvable:$true] %s29_s20  ;;  %s21_s23 = int_to_ptr.vmem [resolvable:$true] %s20_s23 }
   0x2   :  { %s161_s24 = smov [#allocation5]   ;;  %s162_s25 = smov [#allocation3]  }
   0x3   :  { %32 = dma.vmem_to_smem %s30_s20, 16, %s161_s24, [#allocation6]  }
   0x4   :  { %23 = dma.vmem_to_smem %s21_s23, 32, %s162_s25, [#allocation4]  }
   0x5   :  { %s38_s28 = sshll.u32 %s221_s3, 4  ;;  %s163_s29 = smov [#allocation7]   ;;  %s39_s28 = int_to_ptr.vmem [resolvable:$true] %s38_s28 }
   0x6   :  { %41 = dma.vmem_to_smem %s39_s28, 16, %s163_s29, [#allocation6]  }
   0x7   :  { %157 = dma.done.wait [#allocation4], 32  }
   0x8   :  { %158 = vsyncadd [#allocation4], 4294967264 }
   0x9   :  { %159 = dma.done.wait [#allocation6], 32  }
   0xa   :  { %160 = vsyncadd [#allocation6], 4294967264 }
   0xb   :  { %56 = sfence }
   0xc   :  { %s62_s2 = sld [smem:[#allocation3]]  ;;  %v57_v0 = vld [vmem:[%s218_s0] sm:$0xff]  ;;  %v109_v1 = vld [vmem:[%s218_s0 + $0x8] sm:$0xff]  ;;  %v110_v2 = vld [vmem:[%s218_s0 + $0x10] sm:$0xff]  ;;  %v100_v29 = vstv %s222_s4 }
   0xd   :  { %s111_s30 = sld [smem:[#allocation3 + $0x1]] }
   0xe   :  { %s112_s1 = sld [smem:[#allocation3 + $0x2]] }
   0xf   :  { %s73_s6 = sld [smem:[#allocation5]] }
  0x10   :  { %s113_s9 = sld [smem:[#allocation3 + $0x80]] }
  0x11   :  { %s114_s3 = sld [smem:[#allocation3 + $0x81]] }
  0x12   :  { %v63_v3 = vstv %s62_s2  ;;  %s115_s14 = sld [smem:[#allocation3 + $0x82]] }
  0x13   :  { %v64_v4 = vmul.f32 %v63_v3, %v57_v0  ;;  %v66_v5 = vstv %s111_s30  ;;  %s116_s15 = sld [smem:[#allocation5 + $0x1]] }
  0x14   :  { %v67_v6 = vmul.f32 %v109_v1, %v66_v5  ;;  %v70_v7 = vstv %s112_s1  ;;  %s92_s16 = sld [smem:[#allocation7]] }
  0x15   :  { %v71_v8 = vmul.f32 %v110_v2, %v70_v7  ;;  %v74_v11 = vstv %s73_s6  ;;  %s117_s17 = sld [smem:[#allocation7 + $0x1]] }
  0x16   :  { %v68_v9 = vadd.f32 %v67_v6, %v64_v4  ;;  %v77_v10 = vstv %s113_s9 }
  0x17   :  { %v78_v12 = vmul.f32 %v77_v10, %v57_v0  ;;  %v80_v13 = vstv %s114_s3 }
  0x18   :  { %v72_v14 = vadd.f32 %v71_v8, %v68_v9  ;;  %v81_v15 = vmul.f32 %v109_v1, %v80_v13  ;;  %v84_v16 = vstv %s115_s14 }
  0x19   :  { %v85_v17 = vmul.f32 %v110_v2, %v84_v16  ;;  %v88_v20 = vstv %s116_s15 }
  0x1a   :  { %v75_v18 = vadd.f32 %v74_v11, %v72_v14  ;;  %v82_v19 = vadd.f32 %v81_v15, %v78_v12  ;;  %v93_v23 = vstv %s92_s16 }
  0x1b   :  { %v96_v25 = vstv %s117_s17 }
  0x1c   :  { %v86_v21 = vadd.f32 %v85_v17, %v82_v19  ;;  %v90_v22 = vmax.f32 %v75_v18, 0.0 }
  0x1e   :  { %v89_v24 = vadd.f32 %v88_v20, %v86_v21  ;;  %v94_v27 = vmul.f32 %v93_v23, %v90_v22 }
  0x20   :  { %v91_v26 = vmax.f32 %v89_v24, 0.0 }
  0x22   :  { %v97_v28 = vmul.f32 %v96_v25, %v91_v26 }
  0x24   :  { %v98_v30 = vadd.f32 %v97_v28, %v94_v27 }
  0x26   :  { %v101_v31 = vadd.f32 %v100_v29, %v98_v30 }
  0x28   :  { %102 = vst [vmem:[%s223_s5] sm:$0xff] %v101_v31 }
  0x29   :  { %107 = vsyncpa [#allocation4], 1 }
  0x2a   :  { %108 = vsyncpa [#allocation6], 1 }

</bundles_post_ra>
